<compile_context>
chip_gen: v7x
topology: tpu7x:2x2x1
jax: 0.10.0
libtpu: 0.0.40
codegen_flags: <defaults>
</compile_context>

<pallas_src>
import math

import jax
import jax.numpy as jnp
from jax.experimental import pallas as pl
from jax.experimental.pallas import tpu as pltpu


def _add_pe_kernel(x_ref, pe_ref, o_ref):
    # x_ref, pe_ref, o_ref: (tile_rows, feat) — pure vreg-aligned elementwise add.
    o_ref[...] = x_ref[...] + pe_ref[...]


def make_positional_encoding(d_model, max_len=5000, dtype=jnp.float32):
    """Deterministic buffer construction, mirrors the PyTorch __init__."""
    position = jnp.arange(max_len, dtype=jnp.float32)[:, None]          # (max_len, 1)
    div_term = jnp.exp(
        jnp.arange(0, d_model, 2, dtype=jnp.float32) * (-math.log(10000.0) / d_model)
    )                                                                    # (d_model//2,)
    angles = position * div_term                                         # (max_len, d_model//2)
    pe = jnp.zeros((max_len, d_model), dtype=jnp.float32)
    pe = pe.at[:, 0::2].set(jnp.sin(angles))
    pe = pe.at[:, 1::2].set(jnp.cos(angles))
    return pe.astype(dtype)                                              # (max_len, d_model)


def _choose_row_tile(rows_total, feat, itemsize, budget_bytes=2 << 20):
    """Rows per block: multiple of 8 (sublane aligned), ~budget_bytes per buffer."""
    rows = budget_bytes // max(feat * itemsize, 1)
    rows = max(8, (rows // 8) * 8)
    cap = ((rows_total + 7) // 8) * 8      # no point exceeding round_up(T, 8)
    return min(rows, cap)


def positional_encoding_forward(x, pe_full):
    """x: (B, T, D); pe_full: (max_len, D) with max_len >= T. Returns x + pe[:T]."""
    B, T, D = x.shape
    max_len = pe_full.shape[0]

    # Keep PE in the activation dtype (halves PE read traffic for bf16 activations).
    if pe_full.dtype != x.dtype:
        pe_full = pe_full.astype(x.dtype)

    # Lane-dense folding: pack g rows into the lane axis when D < 128 and 128 % D == 0.
    g = 1
    if D < 128 and 128 % D == 0 and T % (128 // D) == 0:
        g = 128 // D
    if g > 1:
        Tk, Dk = T // g, D * g
        xk = x.reshape(B, Tk, Dk)                       # free, contiguous reshape
        ml_g = (max_len // g) * g                       # usually == max_len (no-op slice)
        pek = pe_full[:ml_g].reshape(ml_g // g, Dk)
    else:
        Tk, Dk = T, D
        xk = x
        pek = pe_full

    itemsize = jnp.dtype(x.dtype).itemsize
    tile_rows = _choose_row_tile(Tk, Dk, itemsize)
    n_t = pl.cdiv(Tk, tile_rows)

    out = pl.pallas_call(
        _add_pe_kernel,
        out_shape=jax.ShapeDtypeStruct((B, Tk, Dk), x.dtype),
        grid=(n_t, B),                                   # batch innermost -> PE DMA dedup
        in_specs=[
            # x: one (tile_rows, Dk) slab per (t, b); leading batch dim squeezed away.
            pl.BlockSpec((pl.Squeezed(), tile_rows, Dk), lambda t, b: (b, t, 0)),
            # pe: indexed by t only -> block index unchanged across the inner b loop,
            # so Pallas fetches each PE tile once (full table passed, no wrapper slice).
            pl.BlockSpec((tile_rows, Dk), lambda t, b: (t, 0)),
        ],
        out_specs=pl.BlockSpec((pl.Squeezed(), tile_rows, Dk), lambda t, b: (b, t, 0)),
        compiler_params=pltpu.CompilerParams(
            dimension_semantics=("parallel", "arbitrary"),
        ),
        cost_estimate=pl.CostEstimate(
            flops=B * T * D,
            transcendentals=0,
            bytes_accessed=(2 * B * T * D + T * D) * itemsize,
        ),
    )(xk, pek)

    return out.reshape(B, T, D) if g > 1 else out


if __name__ == "__main__":
    # Small, module-consistent shapes: batch=2, time_steps=8, d_model=32
    B, T, D = 2, 8, 32
    max_len = 64

    key = jax.random.PRNGKey(0)
    x = jax.random.normal(key, (B, T, D), dtype=jnp.float32)

    pe_full = make_positional_encoding(D, max_len=max_len, dtype=jnp.float32)

    out = positional_encoding_forward(x, pe_full)
    out = jax.block_until_ready(out)

    # Reference check (pure JAX), matching torch semantics exactly.
    ref = x + pe_full[None, :T, :]
    assert out.shape == (B, T, D)
    assert jnp.allclose(out, ref, atol=1e-6, rtol=1e-6)

    print("KERNEL_OK")
</pallas_src>

<mosaic_0001>
module attributes {stable_mosaic.version = 11 : i64} {
  func.func @_add_pe_kernel(%arg0: i32, %arg1: i32, %arg2: memref<1x8x128xf32, #tpu.memory_space<vmem>>, %arg3: memref<8x128xf32, #tpu.memory_space<vmem>>, %arg4: memref<1x8x128xf32, #tpu.memory_space<vmem>>) attributes {dimension_semantics = [#tpu.dimension_semantics<parallel>, #tpu.dimension_semantics<arbitrary>], iteration_bounds = array<i64: 1, 2>, scalar_prefetch = 0 : i64, scratch_operands = 0 : i64, tpu.core_type = #tpu.core_type<tc>, window_params = [{transform_indices = @transform_0, window_bounds = array<i64: 1, 8, 128>}, {transform_indices = @transform_1, window_bounds = array<i64: 8, 128>}, {transform_indices = @transform_2, window_bounds = array<i64: 1, 8, 128>}]} {
    %c0 = arith.constant 0 : index
    %c0_0 = arith.constant 0 : index
    %c0_1 = arith.constant 0 : index
    %0 = vector.load %arg2[%c0, %c0_0, %c0_1] : memref<1x8x128xf32, #tpu.memory_space<vmem>>, vector<1x8x128xf32>
    %1 = vector.shape_cast %0 : vector<1x8x128xf32> to vector<8x128xf32>
    %c0_2 = arith.constant 0 : index
    %c0_3 = arith.constant 0 : index
    %2 = vector.load %arg3[%c0_2, %c0_3] : memref<8x128xf32, #tpu.memory_space<vmem>>, vector<8x128xf32>
    %3 = arith.addf %1, %2 : vector<8x128xf32>
    %c0_4 = arith.constant 0 : index
    %c0_5 = arith.constant 0 : index
    %c0_6 = arith.constant 0 : index
    %4 = vector.load %arg4[%c0_4, %c0_5, %c0_6] : memref<1x8x128xf32, #tpu.memory_space<vmem>>, vector<1x8x128xf32>
    %5 = vector.shape_cast %4 : vector<1x8x128xf32> to vector<8x128xf32>
    %6 = vector.shape_cast %3 : vector<8x128xf32> to vector<1x8x128xf32>
    tpu.vector_store %arg4[%c0_4, %c0_5, %c0_6], %6 {strides = array<i32>} : memref<1x8x128xf32, #tpu.memory_space<vmem>>, vector<1x8x128xf32>,
    return
  }
  func.func @transform_0(%arg0: i32, %arg1: i32) -> (i32, i32, i32) {
    %c0_i32 = arith.constant 0 : i32
    %c0_i32_0 = arith.constant 0 : i32
    return %arg1, %arg0, %c0_i32 : i32, i32, i32
  }
  func.func @transform_1(%arg0: i32, %arg1: i32) -> (i32, i32) {
    %c0_i32 = arith.constant 0 : i32
    %c0_i32_0 = arith.constant 0 : i32
    return %arg0, %c0_i32 : i32, i32
  }
  func.func @transform_2(%arg0: i32, %arg1: i32) -> (i32, i32, i32) {
    %c0_i32 = arith.constant 0 : i32
    %c0_i32_0 = arith.constant 0 : i32
    return %arg1, %arg0, %c0_i32 : i32, i32, i32
  }
}

</mosaic_0001>

<bundles_post_ra>
// kernel: tpu_custom_call.1
= control target key start
LH: loop header
LB: loop body
LE: loop exit
PB: predicated region body
PF: predicated region fallthrough
CT: control target
= control target key end

     0   :  { %7 = vsyncpa [#allocation3], 0  ;;  %s762_s0 = inlined_call_operand.hbm [shape: f32[2,2,128], index: 0, kind: input, shape index: {}]   ;;  %s763_s1 = inlined_call_operand.hbm [shape: f32[16,128], index: 1, kind: input, shape index: {}]   ;;  %s764_s2 = inlined_call_operand.hbm [shape: f32[2,2,128], index: 2, kind: output, shape index: {}]  }
   0x1   :  { %9 = vsyncpa [#allocation3 + $0x1], 0 }
   0x2   :  { %10 = vsyncpa [#allocation6], 0 }
   0x3   :  { %11 = vsyncpa [#allocation4], 0 }
   0x4   :  { %13 = vsyncpa [#allocation4 + $0x1], 0  ;;  %s572_s9 = smov 0   ;;  %s574_s10 = smov 0  }
   0x5   :  { %s576_s11 = smov 0   ;;  %s578_s12 = smov 0  }
   0x6   :  { %s580_s13 = smov 0   ;;  %s582_s14 = smov 0  }
   0x7 LB: > { %s329_s15 = sadd.s32 4294967295, %s548_s14   ;;  %s330_s16 = sadd.s32 4294967294, %s548_s14   ;;  %s548_s14 = sphi %s582_s14, %s19_s14   ;;  %s544_s13 = sphi %s580_s13, %s786_s13   ;;  %s540_s12 = sphi %s578_s12, %s785_s12   ;;  %s536_s11 = sphi %s576_s11, %s784_s11   ;;  %s532_s10 = sphi %s574_s10, %s783_s10   ;;  %s528_s9 = sphi %s572_s9, %s782_s9  }
   0x8   : > { %s28_s17 = sadd.s32 1, %s544_s13  ;;  %s40_s18 = sadd.s32 1, %s536_s11 }
   0x9   : > { %p29_p0 = scmp.ge.s32.totalorder %s28_s17, 2  ;;  %p47_p1 = scmp.ne.s32.totalorder %s536_s11, %s532_s10 }
   0xa   : > { %p48_p2 = scmp.eq.s32.totalorder %s548_s14, 0  ;;  %p53_p3 = scmp.ne.s32.totalorder %s532_s10, %s528_s9 }
   0xb   : > { %s788_s17 = smov (%p29_p0, %s28_s17), 0  ;;  %p617_p5 = scmp.eq.s32.totalorder %s329_s15, 0 }
   0xc   : > { %p613_p4 = por %p48_p2, %p47_p1  ;;  %s35_s21 = ssub.s32 %s544_s13, %s788_s17 }
   0xd   : > { %s770_s20 = scalar_select %p617_p5, 1, 0 }
   0xe   : > { %s769_s19 = scalar_select %p613_p4, 1, 0 }
   0xf   : > { %p105_p6 = scmp.eq.s32.totalorder %s329_s15, 1  ;;  %p38_p7 = scmp.eq.s32.totalorder %s35_s21, 0 }
  0x10   : > { %p625_p8 = por %p617_p5, %p53_p3  ;;  %p111_p10 = scmp.eq.s32.totalorder %s330_s16, 1 }
  0x11   : > { %p629_p9 = por %p105_p6, %p47_p1  ;;  %p331_p12 = scmp.ge.s32.totalorder %s548_s14, 1 }
  0x12   : > { %s771_s22 = scalar_select %p625_p8, 1, 0 }
  0x13   : > { %s772_s23 = scalar_select %p629_p9, 1, 0 }
  0x14   : > { %s634_s24 = scalar_select %p38_p7, %s536_s11, %s40_s18  }
  0x15   : > { %p636_p11 = por %p111_p10, %p53_p3  ;;  %p118_p13 = scmp.lt.s32.totalorder %s548_s14, 3 }
  0x16   : > { %s550_s27 = smov [#allocation5]   ;;  %s414_s4 = scalar_lea.hbm %s763_s1, 128 }
  0x17   : > { %s773_s25 = scalar_select %p636_p11, 1, 0 }
  0x18   : > { %p642_p0 = pnand %p331_p12, %p118_p13  ;;  %s133_s28 = sshll.u32 %s550_s27, 4  ;;  %s134_s28 = int_to_ptr.vmem [resolvable:$true] %s133_s28 }
  0x19   : > { %p415_p3 = scmp.ne.s32.totalorder %s763_s1, %s414_s4  ;;  %s419_s15 = scalar_lea.hbm %s763_s1, 256 }
  0x1a   : > { %s774_s26 = scalar_select %p642_p0, 1, 0 }
  0x1b   : > { %p350_p1 = pneg %p642_p0  ;;  %p420_p12 = scmp.lt.u32.totalorder %s419_s15, %s414_s4 }
  0x1c   : > { %p421_p13 = scmp.lt.u32.totalorder %s414_s4, %s763_s1 }
  0x1d   : > { %p650_p2 = pnand %p350_p1, %p617_p5 }
  0x1e   : > { %p422_p1 = por %p421_p13, %p420_p12 }
  0x1f   : > { %p416_p6 = pneg %p650_p2 }
  0x21   : > { %p417_p7 = pnand %p416_p6, %p415_p3 }
  0x23   : > { %p418_p10 = pneg %p417_p7 }
  0x25   : > { %p423_p11 = pnand %p422_p1, %p418_p10 }
  0x27   : > { %426 = shalt.err (!%p423_p11)
}
  0x28   : > { %s427_s21 = scalar_lea.vmem %s134_s28, 128  ;;  %p435_p0 = scmp.lt.s32.totalorder %s134_s28, %s134_s28 }
  0x29   : > { %p428_p9 = scmp.ne.s32.totalorder %s134_s28, %s427_s21  ;;  %p436_p4 = scmp.lt.s32.totalorder %s427_s21, %s427_s21 }
  0x2b   : > { %p430_p5 = pnand %p428_p9, %p416_p6  ;;  %p437_p3 = por %p436_p4, %p435_p0 }
  0x2d   : > { %p431_p8 = pneg %p430_p5 }
  0x2f   : > { %p438_p7 = pnand %p437_p3, %p431_p8 }
  0x31   : > { %441 = shalt.err (!%p438_p7)
}
  0x32   : > { %353 = dma.hbm_to_vmem [thread:$0]  (!%p650_p2), %s763_s1, 128, %s134_s28, [#allocation6]  }
  0x33   : > { %p333_p12 = scmp.ge.s32.totalorder %s548_s14, 2 }
  0x34   : > { %p776_p11 = scmp.ne.s32.totalorder (!%p333_p12), %s769_s19, 0 }
  0x35   : > { %140 = sbr.rel (%p333_p12) target bundleno = 91 (0x5b), region = 20 }
  0x3c   : > { %143 = sbr.rel (!%p776_p11) target bundleno = 91 (0x5b), region = 24  ;;  %s144_s3 = sand.u32 (%p776_p11), 1, %s536_s11  }
  0x3d   : > { %s334_s4 = sshll.u32 (%p776_p11), %s144_s3, 3  ;;  %s679_s5 = scalar_lea.sflag (%p776_p11), [#allocation3], %s144_s3 }
  0x3e   : > { %s148_s6 = scalar_lea.vmem (%p776_p11), [#allocation2], %s334_s4 }
  0x43   : > { %154 = vsyncadd %s679_s5, 96  ;;  %s335_s29 = sshll.u32 %s544_s13, 5  ;;  %s160_s7 = sshll.u32 %s148_s6, 4  ;;  %s161_s7 = int_to_ptr.vmem [resolvable:$true] %s160_s7 }
  0x44   : > { %s686_s15 = scalar_lea.hbm %s762_s0, %s335_s29  ;;  %s444_s21 = scalar_lea.hbm %s762_s0, 64 }
  0x45   : > { %s442_s19 = scalar_lea.hbm %s686_s15, 32  ;;  %p445_p5 = scmp.lt.u32.totalorder %s686_s15, %s762_s0 }
  0x46   : > { %p443_p4 = scmp.ne.s32.totalorder %s686_s15, %s442_s19  ;;  %p446_p8 = scmp.lt.u32.totalorder %s444_s21, %s442_s19 }
  0x47   : > { %p448_p0 = scmp.lt.u32.totalorder %s442_s19, %s686_s15 }
  0x48   : > { %p447_p9 = por %p446_p8, %p445_p5 }
  0x4a   : > { %p449_p2 = por %p448_p0, %p447_p9 }
  0x4c   : > { %p450_p6 = pnand %p449_p2, %p443_p4 }
  0x4e   : > { %453 = shalt.err (!%p450_p6)
}
  0x4f   : > { %s454_s3 = scalar_lea.vmem %s161_s7, 32  ;;  %s551_s4 = smov [#allocation2]  }
  0x50   : > { %p455_p10 = scmp.ne.s32.totalorder %s161_s7, %s454_s3  ;;  %s456_s6 = sshll.u32 %s551_s4, 4  ;;  %s457_s6 = int_to_ptr.vmem [resolvable:$false] %s456_s6 }
  0x51   : > { %s458_s29 = scalar_lea.vmem %s457_s6, 256  ;;  %p459_p13 = scmp.lt.s32.totalorder %s161_s7, %s457_s6 }
  0x52   : > { %p460_p1 = scmp.lt.s32.totalorder %s458_s29, %s454_s3 }
  0x54   : > { %p461_p3 = por %p460_p1, %p459_p13 }
  0x56   : > { %p462_p7 = pnand %p461_p3, %p455_p10 }
  0x58   : > { %465 = shalt.err (!%p462_p7)
}
  0x59   : > { %s552_s28 = smov 32   ;;  %s553_s8 = smov 2  }
  0x5a   : > { %166 = dma.hbm_to_vmem [thread:$0]  %s686_s15, 32, %s161_s7, %s679_s5, %s552_s28, %s552_s28, %s553_s8  }
  0x5b PF: > { %p777_p11 = scmp.ne.s32.totalorder %s774_s26, 0 }
  0x5c   : > { %s703_s19 = sand.u32 (!%p777_p11), 1, %s532_s10   ;;  %p778_p4 = scmp.ne.s32.totalorder (!%p777_p11), %s771_s22, 0 }
  0x5d   : > { %172 = sbr.rel (%p777_p11) target bundleno = 139 (0x8b), region = 28  ;;  %s337_s16 = sshll.u32 (!%p777_p11), %s703_s19, 3 }
  0x5e   : > { %s175_s18 = scalar_lea.sflag (!%p777_p11), [#allocation3], %s703_s19  ;;  %s178_s21 = scalar_lea.vmem (!%p777_p11), [#allocation2], %s337_s16 }
  0x64   : > { %515 = dma.done.wait (%p778_p4), %s175_s18, 128  }
  0x65   : > { %517 = vsyncadd (%p778_p4), %s175_s18, 4294967168  ;;  %p779_p5 = scmp.ne.s32.totalorder %s770_s20, 0 }
  0x67   : > { %519 = dma.done.wait (%p779_p5), [#allocation6], 128  }
  0x68   : > { %521 = vsyncadd (%p779_p5), [#allocation6], 4294967168  ;;  %v209_v0 = vld [vmem:[%s178_s21] sm:$0xff]  ;;  %v210_v1 = vld [vmem:[#allocation5] sm:$0xff]  ;;  %s202_s26 = scalar_lea.vmem [#allocation7], %s337_s16  ;;  %s214_s5 = scalar_lea.sflag [#allocation4], %s703_s19 }
  0x69   : > { %v211_v2 = vadd.f32 %v210_v1, %v209_v0  ;;  %p780_p8 = scmp.ne.s32.totalorder %s772_s23, 0 }
  0x6b   : > { %212 = vst [vmem:[%s202_s26] sm:$0xff] %v211_v2  ;;  %220 = sbr.rel (!%p780_p8) target bundleno = 139 (0x8b), region = 40 }
  0x72   : > { %226 = vsyncadd %s214_s5, 96  ;;  %s341_s22 = sshll.u32 %s540_s12, 5  ;;  %s232_s7 = sshll.u32 %s202_s26, 4  ;;  %s233_s7 = int_to_ptr.vmem [resolvable:$true] %s232_s7 }
  0x73   : > { %s724_s20 = scalar_lea.hbm %s764_s2, %s341_s22  ;;  %s466_s30 = scalar_lea.vmem %s233_s7, 32 }
  0x74   : > { %p467_p9 = scmp.ne.s32.totalorder %s233_s7, %s466_s30  ;;  %s554_s3 = smov [#allocation7]  }
  0x75   : > { %s468_s4 = sshll.u32 %s554_s3, 4  ;;  %s469_s4 = int_to_ptr.vmem [resolvable:$false] %s468_s4 }
  0x76   : > { %s470_s6 = scalar_lea.vmem %s469_s4, 256  ;;  %p471_p0 = scmp.lt.s32.totalorder %s233_s7, %s469_s4 }
  0x77   : > { %p472_p2 = scmp.lt.s32.totalorder %s470_s6, %s466_s30 }
  0x79   : > { %p473_p6 = por %p472_p2, %p471_p0 }
  0x7b   : > { %p474_p10 = pnand %p473_p6, %p467_p9 }
  0x7d   : > { %477 = shalt.err (!%p474_p10)
}
  0x7e   : > { %s478_s12 = scalar_lea.hbm %s724_s20, 32  ;;  %s480_s28 = scalar_lea.hbm %s764_s2, 64 }
  0x7f   : > { %p479_p13 = scmp.ne.s32.totalorder %s724_s20, %s478_s12  ;;  %p481_p1 = scmp.lt.u32.totalorder %s724_s20, %s764_s2 }
  0x80   : > { %p482_p3 = scmp.lt.u32.totalorder %s480_s28, %s478_s12  ;;  %p484_p11 = scmp.lt.u32.totalorder %s478_s12, %s724_s20 }
  0x82   : > { %p483_p7 = por %p482_p3, %p481_p1 }
  0x84   : > { %p485_p4 = por %p484_p11, %p483_p7 }
  0x86   : > { %p486_p5 = pnand %p485_p4, %p479_p13 }
  0x88   : > { %489 = shalt.err (!%p486_p5)
}
  0x89   : > { %s555_s18 = smov 32   ;;  %s556_s21 = smov 2  }
  0x8a   : > { %238 = dma.vmem_to_hbm [thread:$0]  %s233_s7, 32, %s724_s20, %s214_s5, %s555_s18, %s555_s18, %s556_s21  }
  0x8b PF: > { %s247_s26 = sand.u32 1, %s528_s9   ;;  %p781_p8 = scmp.ne.s32.totalorder %s773_s25, 0 }
  0x8c   : > { %s248_s22 = scalar_lea.sflag [#allocation4], %s247_s26 }
  0x8d   : > { %p355_p9 = pnand %p333_p12, %p781_p8 }
  0x8f   : > { %523 = dma.done.wait (!%p355_p9), %s248_s22, 128  }
  0x90   : > { %525 = vsyncadd (!%p355_p9), %s248_s22, 4294967168  ;;  %s19_s14 = sadd.s32 1, %s548_s14   ;;  %s782_s9 = smov %s532_s10 }
  0x91   : > { %p16_p0 = scmp.ge.s32.totalorder %s19_s14, 4   ;;  %s783_s10 = smov %s536_s11 }
  0x92   : > { %s784_s11 = smov %s634_s24  ;;  %s785_s12 = smov %s544_s13 }
  0x93   : > { %s786_s13 = smov %s788_s17  ;;  %18 = sbr.rel (!%p16_p0) target bundleno = 7 (0x7), region = 78 }
  0x9a   :  { %253 = vsyncpa [#allocation3], 1 }
  0x9b   :  { %255 = vsyncpa [#allocation3 + $0x1], 1 }
  0x9c   :  { %256 = vsyncpa [#allocation6], 1 }
  0x9d   :  { %257 = vsyncpa [#allocation4], 1 }
  0x9e   :  { %259 = vsyncpa [#allocation4 + $0x1], 1 }

</bundles_post_ra>
